<compile_context>
chip_gen: v7x
topology: tpu7x:2x2x1
jax: 0.10.0
libtpu: 0.0.40
codegen_flags: <defaults>
</compile_context>

<pallas_src>
import functools

import jax
import jax.numpy as jnp
from jax.experimental import pallas as pl
from jax.experimental.pallas import tpu as pltpu

_LANE = 128        # hidden / output feature dims are zero-padded to this
_SUBLANE = 8       # input feature dim is rounded up to this (sublane width)
_TB_TARGET = 1024  # batch-tile rows (mem-bound roofline sweet spot)


def _round_up(n, m):
    return ((n + m - 1) // m) * m


def _mlp_kernel(*refs, num_hidden_layers):
    """Fused MLP forward for one batch tile.

    refs = (x_ref, w0, b0, ..., w_{L-1}, b_{L-1}, w_head_row, b_head, out_ref)
      x_ref:       (TB, in_kd)        f32 (cast to bf16 in-VMEM)
      w_i:         (d_in_p, d_out_p)  bf16 (d_out_p padded to 128)
      b_i:         (1, d_out_p)       f32  (padded entries are 0)
      w_head_row:  (1, d_last_p)      f32  (transposed head weight)
      b_head:      (1, 1)             f32
      out_ref:     (TB, 1)            f32
    """
    x_ref = refs[0]
    out_ref = refs[-1]
    param_refs = refs[1:-1]

    x = x_ref[...]
    h_mxu = x.astype(jnp.bfloat16)                       # MXU operand
    # Only needed when the head is applied directly to the input.
    h_f32 = x.astype(jnp.float32) if num_hidden_layers == 0 else None

    # Hidden stack: Linear -> ReLU -> (Dropout == identity in eval mode).
    # bf16 MXU operands, f32 accumulate, bias + ReLU in f32 (v5e-safe).
    for i in range(num_hidden_layers):
        w = param_refs[2 * i][...]                       # bf16 (d_in_p, d_out_p)
        b = param_refs[2 * i + 1][...]                   # f32  (1, d_out_p)
        acc = jnp.dot(h_mxu, w, preferred_element_type=jnp.float32)
        h_f32 = jnp.maximum(acc + b, 0.0)
        if i + 1 < num_hidden_layers:                    # last cast is dead
            h_mxu = h_f32.astype(jnp.bfloat16)

    # Regression head (hidden -> 1): an N=1 MXU matmul wastes the array, so do
    # a VPU elementwise multiply + XLU lane reduce.  Padded hidden columns are
    # exactly 0 (zero bias pad + ReLU) and padded w_row entries are 0, so they
    # contribute nothing.
    w_row = param_refs[-2][...]                          # f32 (1, d_last_p)
    b_out = param_refs[-1][...]                          # f32 (1, 1)
    y = jnp.sum(h_f32 * w_row, axis=-1, keepdims=True) + b_out   # (TB, 1)
    out_ref[...] = y


def init_params(key, input_dim, hidden_dim, num_layers):
    """PyTorch-style uniform fan-in init.  W already transposed to [in, out]."""
    dims = [input_dim] + [hidden_dim] * num_layers + [1]
    params = []
    for i in range(len(dims) - 1):
        fan_in, fan_out = dims[i], dims[i + 1]
        key, kw, kb = jax.random.split(key, 3)
        bound = 1.0 / jnp.sqrt(fan_in)
        w = jax.random.uniform(kw, (fan_in, fan_out), jnp.float32, -bound, bound)
        b = jax.random.uniform(kb, (1, fan_out), jnp.float32, -bound, bound)
        params.append((w, b))
    return params


def prepare_params(params):
    """One-time pad/cast of the weights (hoisted out of the per-call path).

    Returns a flat tuple:
      (w_0, b_0, ..., w_{L-1}, b_{L-1}, w_head_row, b_head)
      w_i        : bf16 (d_in_p, d_out_p)   d_out_p = round_up(d_out, 128);
                   layer-0 d_in_p = round_up(input_dim, 8), others = prev d_out_p
      b_i        : f32  (1, d_out_p)        padded entries are 0
      w_head_row : f32  (1, d_last_p)       transposed head weight, zero-padded
      b_head     : f32  (1, 1)
    """
    flat = []
    k_pad = _round_up(params[0][0].shape[0], _SUBLANE)
    for w, b in params[:-1]:
        fi, fo = w.shape
        fo_p = _round_up(fo, _LANE)
        w_p = jnp.pad(w, ((0, k_pad - fi), (0, fo_p - fo))).astype(jnp.bfloat16)
        b_p = jnp.pad(b, ((0, 0), (0, fo_p - fo))).astype(jnp.float32)
        flat += [w_p, b_p]
        k_pad = fo_p
    w_out, b_out = params[-1]
    w_row = jnp.pad(w_out.astype(jnp.float32).T,
                    ((0, 0), (0, k_pad - w_out.shape[0])))
    flat += [w_row, jnp.asarray(b_out, jnp.float32).reshape(1, 1)]
    return tuple(flat)


def regression_net_forward(x, flat_params):
    """x: [batch, input_dim] f32, flat_params from prepare_params() -> [batch, 1]."""
    flat_params = tuple(flat_params)
    batch, in_dim = x.shape
    num_hidden_layers = (len(flat_params) - 2) // 2
    if num_hidden_layers > 0:
        in_kd = flat_params[0].shape[0]
    else:
        in_kd = flat_params[-2].shape[1]

    # Batch tiling: round tile to 16 rows (bf16 sublane packing), pad batch so
    # every grid step is a full tile.
    tb = min(_TB_TARGET, _round_up(batch, 16))
    padded_batch = _round_up(batch, tb)
    x_p = jnp.pad(x, ((0, padded_batch - batch), (0, in_kd - in_dim)))

    grid = (padded_batch // tb,)
    x_spec = pl.BlockSpec((tb, in_kd), lambda i: (i, 0))
    # Constant index_map -> weights/biases stay VMEM-resident across tiles.
    param_specs = [pl.BlockSpec(p.shape, lambda i: (0, 0)) for p in flat_params]
    out_spec = pl.BlockSpec((tb, 1), lambda i: (i, 0))
    out_shape = jax.ShapeDtypeStruct((padded_batch, 1), jnp.float32)

    # Advisory cost estimate so XLA schedules surrounding ops sensibly.
    flops = 0
    for i in range(num_hidden_layers):
        k, n = flat_params[2 * i].shape
        flops += 2 * padded_batch * k * n
    flops += 2 * padded_batch * flat_params[-2].shape[1]      # head mul+reduce
    bytes_accessed = (int(x_p.size) * x_p.dtype.itemsize
                      + sum(int(p.size) * p.dtype.itemsize for p in flat_params)
                      + padded_batch * 4)

    kernel = functools.partial(_mlp_kernel, num_hidden_layers=num_hidden_layers)

    out = pl.pallas_call(
        kernel,
        out_shape=out_shape,
        grid=grid,
        in_specs=[x_spec] + param_specs,
        out_specs=out_spec,
        compiler_params=pltpu.CompilerParams(
            # Independent batch tiles: parallel axis (sharded across both
            # TensorCores on v7x; harmless no-op on single-core v5e/v6e).
            dimension_semantics=("parallel",),
        ),
        cost_estimate=pl.CostEstimate(
            flops=flops, transcendentals=0, bytes_accessed=bytes_accessed),
    )(x_p, *flat_params)

    # Drop batch padding; output is already (batch, 1).
    return out[:batch]


def regression_net_ref(x, params):
    """Plain-JAX reference mirroring the kernel's bf16-MXU / f32-accumulate math."""
    h = x.astype(jnp.float32)
    for w, b in params[:-1]:
        acc = jnp.dot(h.astype(jnp.bfloat16), w.astype(jnp.bfloat16),
                      preferred_element_type=jnp.float32)
        h = jnp.maximum(acc + b, 0.0)
    w, b = params[-1]
    return jnp.dot(h, w, preferred_element_type=jnp.float32) + b


if __name__ == "__main__":
    # Small shapes consistent with the module's forward (x: [batch, input_dim]).
    batch, input_dim, hidden_dim, num_layers, dropout = 8, 16, 32, 3, 0.1

    key = jax.random.PRNGKey(0)
    key, kx = jax.random.split(key)
    x = jax.random.normal(kx, (batch, input_dim), jnp.float32)

    params = init_params(key, input_dim, hidden_dim, num_layers)
    flat = prepare_params(params)                 # one-time pad/cast (hoisted)
    fwd = jax.jit(regression_net_forward)

    out = jax.block_until_ready(fwd(x, flat))
    ref = regression_net_ref(x, params)
    assert out.shape == (batch, 1), out.shape
    assert jnp.allclose(out, ref, atol=1e-3, rtol=1e-3), "mismatch vs reference"

    # Larger, non-multiple batch: exercises the multi-tile grid (TB=1024),
    # batch padding and the software pipeline path.
    key, kx2 = jax.random.split(key)
    x2 = jax.random.normal(kx2, (2000, input_dim), jnp.float32)
    out2 = jax.block_until_ready(fwd(x2, flat))
    ref2 = regression_net_ref(x2, params)
    assert out2.shape == (2000, 1), out2.shape
    assert jnp.allclose(out2, ref2, atol=1e-3, rtol=1e-3), "mismatch vs reference (large batch)"

    print("KERNEL_OK")
</pallas_src>

<mosaic_0001>
module attributes {stable_mosaic.version = 11 : i64} {
  func.func @_mlp_kernel(%arg0: i32, %arg1: memref<16x16xf32, #tpu.memory_space<vmem>>, %arg2: memref<16x128xbf16, #tpu.memory_space<vmem>>, %arg3: memref<1x128xf32, #tpu.memory_space<vmem>>, %arg4: memref<128x128xbf16, #tpu.memory_space<vmem>>, %arg5: memref<1x128xf32, #tpu.memory_space<vmem>>, %arg6: memref<128x128xbf16, #tpu.memory_space<vmem>>, %arg7: memref<1x128xf32, #tpu.memory_space<vmem>>, %arg8: memref<1x128xf32, #tpu.memory_space<vmem>>, %arg9: memref<1x1xf32, #tpu.memory_space<vmem>>, %arg10: memref<16x1xf32, #tpu.memory_space<vmem>>) attributes {dimension_semantics = [#tpu.dimension_semantics<parallel>], iteration_bounds = array<i64: 1>, scalar_prefetch = 0 : i64, scratch_operands = 0 : i64, tpu.core_type = #tpu.core_type<tc>, window_params = [{transform_indices = @transform_0, window_bounds = array<i64: 16, 16>}, {pipeline_mode = #tpu.pipeline_mode<synchronous>, transform_indices = @transform_1, window_bounds = array<i64: 16, 128>}, {pipeline_mode = #tpu.pipeline_mode<synchronous>, transform_indices = @transform_2, window_bounds = array<i64: 1, 128>}, {pipeline_mode = #tpu.pipeline_mode<synchronous>, transform_indices = @transform_3, window_bounds = array<i64: 128, 128>}, {pipeline_mode = #tpu.pipeline_mode<synchronous>, transform_indices = @transform_4, window_bounds = array<i64: 1, 128>}, {pipeline_mode = #tpu.pipeline_mode<synchronous>, transform_indices = @transform_5, window_bounds = array<i64: 128, 128>}, {pipeline_mode = #tpu.pipeline_mode<synchronous>, transform_indices = @transform_6, window_bounds = array<i64: 1, 128>}, {pipeline_mode = #tpu.pipeline_mode<synchronous>, transform_indices = @transform_7, window_bounds = array<i64: 1, 128>}, {pipeline_mode = #tpu.pipeline_mode<synchronous>, transform_indices = @transform_8, window_bounds = array<i64: 1, 1>}, {transform_indices = @transform_9, window_bounds = array<i64: 16, 1>}]} {
    %c0 = arith.constant 0 : index
    %c0_0 = arith.constant 0 : index
    %0 = vector.load %arg1[%c0, %c0_0] : memref<16x16xf32, #tpu.memory_space<vmem>>, vector<16x16xf32>
    %1 = arith.truncf %0 : vector<16x16xf32> to vector<16x16xbf16>
    %c0_1 = arith.constant 0 : index
    %c0_2 = arith.constant 0 : index
    %2 = vector.load %arg2[%c0_1, %c0_2] : memref<16x128xbf16, #tpu.memory_space<vmem>>, vector<16x128xbf16>
    %c0_3 = arith.constant 0 : index
    %c0_4 = arith.constant 0 : index
    %3 = vector.load %arg3[%c0_3, %c0_4] : memref<1x128xf32, #tpu.memory_space<vmem>>, vector<1x128xf32>
    %cst = arith.constant dense<0.000000e+00> : vector<16x128xf32>
    %4 = tpu.matmul %1, %2, %cst {dimension_numbers = #tpu.dot_dimension_numbers<[1], [0], [0], [1], [0, 0, 1, 1], [], []>} : vector<16x16xbf16>, vector<16x128xbf16>, vector<16x128xf32> -> vector<16x128xf32>
    %5 = vector.broadcast %3 : vector<1x128xf32> to vector<16x128xf32>
    %6 = arith.addf %4, %5 : vector<16x128xf32>
    %cst_5 = arith.constant 0.000000e+00 : f32
    %7 = vector.broadcast %cst_5 : f32 to vector<16x128xf32>
    %8 = arith.maximumf %6, %7 : vector<16x128xf32>
    %9 = arith.truncf %8 : vector<16x128xf32> to vector<16x128xbf16>
    %c0_6 = arith.constant 0 : index
    %c0_7 = arith.constant 0 : index
    %10 = vector.load %arg4[%c0_6, %c0_7] : memref<128x128xbf16, #tpu.memory_space<vmem>>, vector<128x128xbf16>
    %c0_8 = arith.constant 0 : index
    %c0_9 = arith.constant 0 : index
    %11 = vector.load %arg5[%c0_8, %c0_9] : memref<1x128xf32, #tpu.memory_space<vmem>>, vector<1x128xf32>
    %cst_10 = arith.constant dense<0.000000e+00> : vector<16x128xf32>
    %12 = tpu.matmul %9, %10, %cst_10 {dimension_numbers = #tpu.dot_dimension_numbers<[1], [0], [0], [1], [0, 0, 1, 1], [], []>} : vector<16x128xbf16>, vector<128x128xbf16>, vector<16x128xf32> -> vector<16x128xf32>
    %13 = vector.broadcast %11 : vector<1x128xf32> to vector<16x128xf32>
    %14 = arith.addf %12, %13 : vector<16x128xf32>
    %cst_11 = arith.constant 0.000000e+00 : f32
    %15 = vector.broadcast %cst_11 : f32 to vector<16x128xf32>
    %16 = arith.maximumf %14, %15 : vector<16x128xf32>
    %17 = arith.truncf %16 : vector<16x128xf32> to vector<16x128xbf16>
    %c0_12 = arith.constant 0 : index
    %c0_13 = arith.constant 0 : index
    %18 = vector.load %arg6[%c0_12, %c0_13] : memref<128x128xbf16, #tpu.memory_space<vmem>>, vector<128x128xbf16>
    %c0_14 = arith.constant 0 : index
    %c0_15 = arith.constant 0 : index
    %19 = vector.load %arg7[%c0_14, %c0_15] : memref<1x128xf32, #tpu.memory_space<vmem>>, vector<1x128xf32>
    %cst_16 = arith.constant dense<0.000000e+00> : vector<16x128xf32>
    %20 = tpu.matmul %17, %18, %cst_16 {dimension_numbers = #tpu.dot_dimension_numbers<[1], [0], [0], [1], [0, 0, 1, 1], [], []>} : vector<16x128xbf16>, vector<128x128xbf16>, vector<16x128xf32> -> vector<16x128xf32>
    %21 = vector.broadcast %19 : vector<1x128xf32> to vector<16x128xf32>
    %22 = arith.addf %20, %21 : vector<16x128xf32>
    %cst_17 = arith.constant 0.000000e+00 : f32
    %23 = vector.broadcast %cst_17 : f32 to vector<16x128xf32>
    %24 = arith.maximumf %22, %23 : vector<16x128xf32>
    %c0_18 = arith.constant 0 : index
    %c0_19 = arith.constant 0 : index
    %25 = vector.load %arg8[%c0_18, %c0_19] : memref<1x128xf32, #tpu.memory_space<vmem>>, vector<1x128xf32>
    %c0_20 = arith.constant 0 : index
    %c0_21 = arith.constant 0 : index
    %26 = vector.load %arg9[%c0_20, %c0_21] : memref<1x1xf32, #tpu.memory_space<vmem>>, vector<1x1xf32>
    %27 = vector.broadcast %25 : vector<1x128xf32> to vector<16x128xf32>
    %28 = arith.mulf %24, %27 : vector<16x128xf32>
    %cst_22 = arith.constant dense<0.000000e+00> : vector<16xf32>
    %29 = vector.multi_reduction <add>, %28, %cst_22 [1] : vector<16x128xf32> to vector<16xf32>
    %30 = vector.shape_cast %29 : vector<16xf32> to vector<16x1xf32>
    %31 = vector.broadcast %26 : vector<1x1xf32> to vector<16x1xf32>
    %32 = arith.addf %30, %31 : vector<16x1xf32>
    %c0_23 = arith.constant 0 : index
    %c0_24 = arith.constant 0 : index
    %33 = vector.load %arg10[%c0_23, %c0_24] : memref<16x1xf32, #tpu.memory_space<vmem>>, vector<16x1xf32>
    tpu.vector_store %arg10[%c0_23, %c0_24], %32 {strides = array<i32>} : memref<16x1xf32, #tpu.memory_space<vmem>>, vector<16x1xf32>,
    return
  }
  func.func @transform_0(%arg0: i32) -> (i32, i32) {
    %c0_i32 = arith.constant 0 : i32
    %c0_i32_0 = arith.constant 0 : i32
    return %arg0, %c0_i32 : i32, i32
  }
  func.func @transform_1(%arg0: i32) -> (i32, i32) {
    %c0_i32 = arith.constant 0 : i32
    %c0_i32_0 = arith.constant 0 : i32
    %c0_i32_1 = arith.constant 0 : i32
    return %c0_i32, %c0_i32_0 : i32, i32
  }
  func.func @transform_2(%arg0: i32) -> (i32, i32) {
    %c0_i32 = arith.constant 0 : i32
    %c0_i32_0 = arith.constant 0 : i32
    %c0_i32_1 = arith.constant 0 : i32
    return %c0_i32, %c0_i32_0 : i32, i32
  }
  func.func @transform_3(%arg0: i32) -> (i32, i32) {
    %c0_i32 = arith.constant 0 : i32
    %c0_i32_0 = arith.constant 0 : i32
    %c0_i32_1 = arith.constant 0 : i32
    return %c0_i32, %c0_i32_0 : i32, i32
  }
  func.func @transform_4(%arg0: i32) -> (i32, i32) {
    %c0_i32 = arith.constant 0 : i32
    %c0_i32_0 = arith.constant 0 : i32
    %c0_i32_1 = arith.constant 0 : i32
    return %c0_i32, %c0_i32_0 : i32, i32
  }
  func.func @transform_5(%arg0: i32) -> (i32, i32) {
    %c0_i32 = arith.constant 0 : i32
    %c0_i32_0 = arith.constant 0 : i32
    %c0_i32_1 = arith.constant 0 : i32
    return %c0_i32, %c0_i32_0 : i32, i32
  }
  func.func @transform_6(%arg0: i32) -> (i32, i32) {
    %c0_i32 = arith.constant 0 : i32
    %c0_i32_0 = arith.constant 0 : i32
    %c0_i32_1 = arith.constant 0 : i32
    return %c0_i32, %c0_i32_0 : i32, i32
  }
  func.func @transform_7(%arg0: i32) -> (i32, i32) {
    %c0_i32 = arith.constant 0 : i32
    %c0_i32_0 = arith.constant 0 : i32
    %c0_i32_1 = arith.constant 0 : i32
    return %c0_i32, %c0_i32_0 : i32, i32
  }
  func.func @transform_8(%arg0: i32) -> (i32, i32) {
    %c0_i32 = arith.constant 0 : i32
    %c0_i32_0 = arith.constant 0 : i32
    %c0_i32_1 = arith.constant 0 : i32
    return %c0_i32, %c0_i32_0 : i32, i32
  }
  func.func @transform_9(%arg0: i32) -> (i32, i32) {
    %c0_i32 = arith.constant 0 : i32
    %c0_i32_0 = arith.constant 0 : i32
    return %arg0, %c0_i32 : i32, i32
  }
}

</mosaic_0001>

<bundles_post_ra>
// kernel: regression_net_forward.1
= control target key start
LH: loop header
LB: loop body
LE: loop exit
PB: predicated region body
PF: predicated region fallthrough
CT: control target
= control target key end

     0   :  { %s682_s0 = inlined_call_operand.vmem [shape: f32[16,16], index: 0, kind: input, shape index: {}]   ;;  %s683_s1 = inlined_call_operand.vmem [shape: bf16[16,128], index: 1, kind: input, shape index: {}]   ;;  %s684_s2 = inlined_call_operand.vmem [shape: f32[1,128], index: 2, kind: input, shape index: {}]   ;;  %s685_s3 = inlined_call_operand.hbm [shape: bf16[128,128], index: 3, kind: input, shape index: {}]   ;;  %s686_s4 = inlined_call_operand.vmem [shape: f32[1,128], index: 4, kind: input, shape index: {}]   ;;  %s687_s5 = inlined_call_operand.hbm [shape: bf16[128,128], index: 5, kind: input, shape index: {}]   ;;  %s688_s6 = inlined_call_operand.vmem [shape: f32[1,128], index: 6, kind: input, shape index: {}]   ;;  %s689_s7 = inlined_call_operand.vmem [shape: f32[1,128], index: 7, kind: input, shape index: {}]   ;;  %s690_s8 = inlined_call_operand.<no memory space> [shape: f32[1,1], index: 8, kind: input, shape index: {}]   ;;  %s691_s9 = inlined_call_operand.vmem [shape: f32[16,1], index: 9, kind: output, shape index: {}]  }
   0x1   :  { %v14_v0 = vstv %s690_s8 }
   0x2   :  { %15 = vst [vmem:[#allocation2] sm:$0x1] %v14_v0 }
   0x3   :  { %16 = vsyncpa [#allocation4], 0 }
   0x4   :  { %17 = vsyncpa [#allocation6], 0  ;;  %s549_s11 = smov [#allocation3]   ;;  %s501_s15 = scalar_lea.hbm %s685_s3, 1024 }
   0x5   :  { %s29_s12 = sshll.u32 %s549_s11, 4  ;;  %p502_p0 = scmp.ne.s32.totalorder %s685_s3, %s501_s15  ;;  %s30_s12 = int_to_ptr.vmem [resolvable:$true] %s29_s12 }
   0x6   :  { %p505_p1 = scmp.lt.u32.totalorder %s501_s15, %s685_s3 }
   0x8   :  { %p507_p2 = pnand %p505_p1, %p502_p0 }
   0xa   :  { %510 = shalt.err (!%p507_p2)
}
   0xb   :  { %s511_s8 = scalar_lea.vmem %s30_s12, 1024  ;;  %p516_p4 = scmp.lt.s32.totalorder %s30_s12, %s30_s12 }
   0xc   :  { %p512_p3 = scmp.ne.s32.totalorder %s30_s12, %s511_s8  ;;  %p517_p5 = scmp.lt.s32.totalorder %s511_s8, %s511_s8 }
   0xe   :  { %p518_p6 = por %p517_p5, %p516_p4 }
  0x10   :  { %p519_p7 = pnand %p518_p6, %p512_p3 }
  0x12   :  { %522 = shalt.err (!%p519_p7)
}
  0x13   :  { %s550_s20 = smov 64   ;;  %s551_s21 = smov 4  }
  0x14   :  { %35 = dma.hbm_to_vmem [thread:$0]  %s685_s3, 1024, %s30_s12, [#allocation4], %s550_s20, %s550_s20, %s551_s21  }
  0x15   :  { %s552_s24 = smov [#allocation5]   ;;  %s523_s28 = scalar_lea.hbm %s687_s5, 1024 }
  0x16   :  { %s43_s25 = sshll.u32 %s552_s24, 4  ;;  %p524_p8 = scmp.ne.s32.totalorder %s687_s5, %s523_s28  ;;  %s44_s25 = int_to_ptr.vmem [resolvable:$true] %s43_s25 }
  0x17   :  { %p527_p9 = scmp.lt.u32.totalorder %s523_s28, %s687_s5 }
  0x19   :  { %p529_p10 = pnand %p527_p9, %p524_p8 }
  0x1b   :  { %532 = shalt.err (!%p529_p10)
}
  0x1c   :  { %s533_s13 = scalar_lea.vmem %s44_s25, 1024  ;;  %p538_p12 = scmp.lt.s32.totalorder %s44_s25, %s44_s25 }
  0x1d   :  { %p534_p11 = scmp.ne.s32.totalorder %s44_s25, %s533_s13  ;;  %p539_p13 = scmp.lt.s32.totalorder %s533_s13, %s533_s13 }
  0x1f   :  { %p540_p0 = por %p539_p13, %p538_p12 }
  0x21   :  { %p541_p1 = pnand %p540_p0, %p534_p11 }
  0x23   :  { %544 = shalt.err (!%p541_p1)
}
  0x24   :  { %49 = dma.hbm_to_vmem [thread:$0]  %s687_s5, 1024, %s44_s25, [#allocation6], %s550_s20, %s550_s20, %s551_s21  }
  0x25   :  { %545 = dma.done.wait [#allocation4], 1024  }
  0x26   :  { %546 = vsyncadd [#allocation4], 4294966272 }
  0x27   :  { %547 = dma.done.wait [#allocation6], 1024  }
  0x28   :  { %548 = vsyncadd [#allocation6], 4294966272  ;;  %v553_v1 = vmov 0.0   ;;  %vm554_vm0 = vmmov 0   ;;  %v484_v2 = vld [vmem:[%s683_s1] sm:$0xff]   ;;  %v64_v4 = vld [vmem:[%s682_s0 + $0x8] sm:$0xff] }
  0x29   :  { %432 = vmatprep.subr.bf16.mxu0 %v553_v1  ;;  %434 = vmatprep.mubr.msk.bf16.mxu0 %vm554_vm0, %v553_v1  ;;  %v63_v3 = vld [vmem:[%s682_s0] sm:$0xff]  ;;  %vm81_vm1 = vcmask 130048   ;;  %v486_v7 = vld [vmem:[#allocation3 + $0x8] sm:$0xff]   ;;  %v487_v8 = vld [vmem:[#allocation3 + $0x10] sm:$0xff]   ;;  %vm380_vm2 = vcmask 7168  }
  0x2a   :  { %438 = vmatprep.subr.bf16.mxu1 %v553_v1  ;;  %454 = vmatprep.mubr.msk.bf16.mxu1 %vm554_vm0, %v553_v1  ;;  %v65_v5 = vpack.c.bf16 %v64_v4, %v63_v3  ;;  %v485_v6 = vld [vmem:[#allocation3] sm:$0xff]   ;;  %v488_v9 = vld [vmem:[#allocation3 + $0x18] sm:$0xff]   ;;  %v490_v11 = vld [vmem:[#allocation3 + $0x28] sm:$0xff]  }
  0x2b   :  { %433 = vmatpush3.bf16.msra.mxu0 %v484_v2  ;;  %439 = vmatpush3.bf16.msra.mxu1 %v485_v6  ;;  %v489_v10 = vld [vmem:[#allocation3 + $0x20] sm:$0xff]   ;;  %v491_v12 = vld [vmem:[#allocation3 + $0x30] sm:$0xff]   ;;  %v492_v13 = vld [vmem:[#allocation3 + $0x38] sm:$0xff]  }
  0x2c   :  { %458 = vmatprep.subr.bf16.mxu0 %v553_v1  ;;  %440 = vmatprep.subr.bf16.mxu1 %v553_v1  ;;  %v493_v14 = vld [vmem:[#allocation5] sm:$0xff]   ;;  %v494_v15 = vld [vmem:[#allocation5 + $0x8] sm:$0xff]   ;;  %v495_v16 = vld [vmem:[#allocation5 + $0x10] sm:$0xff]  }
  0x2d   :  { %v496_v17 = vld [vmem:[#allocation5 + $0x18] sm:$0xff]   ;;  %v497_v18 = vld [vmem:[#allocation5 + $0x20] sm:$0xff]   ;;  %v498_v19 = vld [vmem:[#allocation5 + $0x28] sm:$0xff]  }
  0x2e   :  { %435 = vmatmul.mubr.msk.bf16.vlgmr.msra.gmra.mrb[0].mxu0 %vm81_vm1, %v65_v5  ;;  %v389_v20 = vld [vmem:[%s684_s2] ss:$0 sm:$0xff]  ;;  %v499_v30 = vld [vmem:[#allocation5 + $0x30] sm:$0xff]  }
  0x2f   :  { %474 = vmatprep.mubr.msk.bf16.mxu0 %vm554_vm0, %v553_v1  ;;  %441 = vmatpush3.bf16.msra.mxu1 %v486_v7  ;;  %v500_v31 = vld [vmem:[#allocation5 + $0x38] sm:$0xff]  }
  0x30   :  { %442 = vmatprep.subr.bf16.mxu1 %v553_v1  ;;  %459 = vmatpush3.bf16.msra.mxu0 %v493_v14  ;;  %v392_v32 = vld [vmem:[%s686_s4] ss:$0 sm:$0xff] }
  0x31   :  { %460 = vmatprep.subr.bf16.mxu0 %v553_v1  ;;  %v401_v42 = vld [vmem:[%s688_s6] ss:$0 sm:$0xff] }
  0x32   :  { %v410_v47 = vld [vmem:[%s689_s7] ss:$0 sm:$0xff] }
  0x33   :  { %443 = vmatpush3.bf16.msra.mxu1 %v487_v8  ;;  %v411_v54 = vld [vmem:[#allocation2] ss:$0 sm:$0xff] }
  0x34   :  { %444 = vmatprep.subr.bf16.mxu1 %v553_v1  ;;  %461 = vmatpush3.bf16.msra.mxu0 %v494_v15 }
  0x35   :  { %462 = vmatprep.subr.bf16.mxu0 %v553_v1 }
  0x37   :  { %445 = vmatpush3.bf16.msra.mxu1 %v488_v9 }
  0x38   :  { %446 = vmatprep.subr.bf16.mxu1 %v553_v1  ;;  %463 = vmatpush3.bf16.msra.mxu0 %v495_v16 }
  0x39   :  { %464 = vmatprep.subr.bf16.mxu0 %v553_v1 }
  0x3b   :  { %447 = vmatpush3.bf16.msra.mxu1 %v489_v10 }
  0x3c   :  { %448 = vmatprep.subr.bf16.mxu1 %v553_v1  ;;  %465 = vmatpush3.bf16.msra.mxu0 %v496_v17 }
  0x3d   :  { %466 = vmatprep.subr.bf16.mxu0 %v553_v1 }
  0x3f   :  { %449 = vmatpush3.bf16.msra.mxu1 %v490_v11 }
  0x40   :  { %450 = vmatprep.subr.bf16.mxu1 %v553_v1  ;;  %467 = vmatpush3.bf16.msra.mxu0 %v497_v18 }
  0x41   :  { %468 = vmatprep.subr.bf16.mxu0 %v553_v1 }
  0x43   :  { %451 = vmatpush3.bf16.msra.mxu1 %v491_v12 }
  0x44   :  { %452 = vmatprep.subr.bf16.mxu1 %v553_v1  ;;  %469 = vmatpush3.bf16.msra.mxu0 %v498_v19 }
  0x45   :  { %470 = vmatprep.subr.bf16.mxu0 %v553_v1 }
  0x47   :  { %453 = vmatpush3.bf16.msra.mxu1 %v492_v13 }
  0x48   :  { %471 = vmatpush3.bf16.msra.mxu0 %v499_v30 }
  0x49   :  { %472 = vmatprep.subr.bf16.mxu0 %v553_v1 }
  0x4c   :  { %473 = vmatpush3.bf16.msra.mxu0 %v500_v31 }
 0x101   :  { %v119_v21 = vpop.f32.mrb[0].mxu0 }
 0x102   :  { %v120_v22 = vadd.f32 %v389_v20, %v119_v21  ;;  %v436_v23 = vpop.f32.mrb[1].mxu0 }
 0x103   :  { %v122_v24 = vpop.f32.mrb[2].mxu0 }
 0x104   :  { %v123_v25 = vadd.f32 %v389_v20, %v122_v24  ;;  %v437_v26 = vpop.f32.mrb[3].mxu0  ;;  %v126_v27 = vmax.f32 %v120_v22, 0.0 }
 0x106   :  { %v127_v28 = vmax.f32 %v123_v25, 0.0 }
 0x108   :  { %v128_v29 = vpack.c.bf16 %v127_v28, %v126_v27 }
 0x10a   :  { %455 = vmatmul.mubr.bf16.vlgmr.msra.gmra.mrb[0].mxu1 %v128_v29 }
 0x1dd   :  { %v234_v33 = vpop.f32.mrb[0].mxu1 }
 0x1de   :  { %v235_v34 = vadd.f32 %v392_v32, %v234_v33  ;;  %v456_v35 = vpop.f32.mrb[1].mxu1 }
 0x1df   :  { %v237_v36 = vpop.f32.mrb[2].mxu1 }
 0x1e0   :  { %v238_v37 = vadd.f32 %v392_v32, %v237_v36  ;;  %v457_v38 = vpop.f32.mrb[3].mxu1  ;;  %v241_v39 = vmax.f32 %v235_v34, 0.0 }
 0x1e2   :  { %v242_v40 = vmax.f32 %v238_v37, 0.0 }
 0x1e4   :  { %v243_v41 = vpack.c.bf16 %v242_v40, %v241_v39 }
 0x1e6   :  { %475 = vmatmul.mubr.bf16.vlgmr.msra.gmra.mrb[4].mxu0 %v243_v41 }
 0x2b9   :  { %v349_v43 = vpop.f32.mrb[4].mxu0 }
 0x2ba   :  { %v350_v44 = vadd.f32 %v401_v42, %v349_v43  ;;  %v476_v45 = vpop.f32.mrb[5].mxu0 }
 0x2bb   :  { %v352_v46 = vpop.f32.mrb[6].mxu0 }
 0x2bc   :  { %v356_v48 = vmax.f32 %v350_v44, 0.0  ;;  %v353_v49 = vadd.f32 %v401_v42, %v352_v46  ;;  %v477_v50 = vpop.f32.mrb[7].mxu0 }
 0x2be   :  { %v357_v51 = vmax.f32 %v353_v49, 0.0  ;;  %v366_v52 = vmul.f32 %v410_v47, %v356_v48 }
 0x2c0   :  { %368 = vadd.xlane.f32.xlu0 %v366_v52  ;;  %v367_v53 = vmul.f32 %v410_v47, %v357_v51 }
 0x2c4   :  { %370 = vadd.xlane.f32.xlu0 %v367_v53 }
 0x34d   :  { %v369_v55 = vpop.xlane.xlu0 %368 }
 0x34e   :  { %v378_v56 = vadd.f32 %v411_v54, %v369_v55 }
 0x350   :  { %381 = vst.msk [vmem:[%s691_s9] sm:$0xff] %vm380_vm2, %v378_v56 }
 0x351   :  { %v371_v57 = vpop.xlane.xlu0 %370 }
 0x352   :  { %v379_v58 = vadd.f32 %v411_v54, %v371_v57 }
 0x354   :  { %382 = vst.msk [vmem:[%s691_s9 + $0x8] sm:$0xff] %vm380_vm2, %v379_v58 }
 0x355   :  { %387 = vsyncpa [#allocation4], 1 }
 0x356   :  { %388 = vsyncpa [#allocation6], 1 }

</bundles_post_ra>
